<compile_context>
chip_gen: v7x
topology: tpu7x:2x2x1
jax: 0.10.0
libtpu: 0.0.40
codegen_flags: <defaults>
</compile_context>

<pallas_src>
import functools

import jax
import jax.numpy as jnp
from jax.experimental import pallas as pl
from jax.experimental.pallas import tpu as pltpu


def _pool_kernel(x_ref, q_ref, o_ref, *, inv_area):
    # x_ref: (bn, P, g*s*W)   P rows per image = (channel, output-row-group)
    # q_ref: (g*s*W, g*Wo)    0/1 block-diagonal selector (exact in any float dtype)
    # o_ref: (bn, P, g*Wo)
    e = pl.program_id(1)

    @pl.when(e == 0)
    def _():
        bn, p, l_in = x_ref.shape
        l_out = o_ref.shape[-1]
        x2 = x_ref[...].reshape(bn * p, l_in)          # leading-dim merge, layout-preserving
        acc = jnp.dot(x2, q_ref[...], preferred_element_type=jnp.float32)
        o_ref[...] = (acc * inv_area).reshape(bn, p, l_out).astype(o_ref.dtype)

    @pl.when(e > 0)
    def _():
        # Expansion channels: exact zeros (see NaN note at top of file).
        o_ref[...] = jnp.zeros_like(o_ref)


def _pick_group(c_in, h_out, stride, w):
    """Smallest divisor g of h_out giving >=128 input lanes and 8-aligned rows."""
    divisors = [d for d in range(1, h_out + 1) if h_out % d == 0]
    if not divisors:
        return 1
    for need_lanes in (True, False):
        for g in divisors:
            lanes_ok = (g * stride * w >= 128) or (not need_lanes)
            rows_ok = (c_in * (h_out // g)) % 8 == 0
            if lanes_ok and rows_ok:
                return g
    return divisors[-1]


@functools.partial(jax.jit, static_argnums=(1, 2))
def downsample_b(x, n_out, stride):
    """Pallas implementation of DownsampleB.forward for NCHW input x."""
    n, c_in, h, w = x.shape
    expand_ratio = max(1, n_out // c_in)          # torch: nOut // nIn
    h_out, w_out = h // stride, w // stride

    # Floor-mode AvgPool: drop trailing rows that don't fill a window.  Trailing
    # columns are handled by all-zero rows in the selector (no W slice needed).
    if h != h_out * stride:
        x = x[:, :, : h_out * stride, :]

    # ---- factorized, block-diagonal pooling selector ------------------------
    g = _pick_group(c_in, h_out, stride, w)
    l_in = g * stride * w                         # lane width of the input rows
    l_out = g * w_out                             # lane width of the output rows
    p_rows = c_in * (h_out // g)                  # rows per image

    # Pw[b, k] = 1 iff input column b lands in output column k.
    pw = (jnp.arange(w)[:, None] // stride) == jnp.arange(w_out)[None, :]
    q = jnp.tile(pw, (stride, 1))                 # (s*W, Wo): also sums the s sub-rows
    qg = jnp.eye(g, dtype=bool)[:, None, :, None] & q[None, :, None, :]
    qg = qg.reshape(l_in, l_out).astype(x.dtype)  # kron(I_g, Q); a few KB, not MB

    # ---- tiling --------------------------------------------------------------
    itemsize = x.dtype.itemsize
    fuse_zeros = (p_rows % 8 == 0)                # out-block 2nd-minor must be 8-aligned
    r_grid = expand_ratio if fuse_zeros else 1

    bytes_per_image = p_rows * l_in * itemsize
    target_block_bytes = 4 << 20                  # ~4 MB input blocks: inside default
    if fuse_zeros:                                # scoped VMEM on v5e/v6e/v7x
        max_bn = max(1, target_block_bytes // max(1, bytes_per_image))
        if n >= 2:                                # >= 2 parallel steps -> both v7x TCs busy
            max_bn = min(max_bn, -(-n // 2))
        bn = max(d for d in range(1, n + 1) if n % d == 0 and d <= max_bn)
    else:
        bn = 1                                    # keeps the in-kernel row merge trivial
    # TODO(synk): for very large maps (e.g. 224x224, C_in=64) bn=1 blocks can still
    # exceed the VMEM budget; such shapes would need an additional row-split axis.

    grid = (n // bn, r_grid)
    x_rows = x.reshape(n, p_rows, l_in)           # free reshape of contiguous NCHW

    in_block = bn * p_rows * l_in * itemsize
    out_block = bn * p_rows * l_out * itemsize
    q_bytes = l_in * l_out * itemsize
    vmem_limit = int(min(60 << 20,
                         max(24 << 20, 2 * (in_block + out_block + q_bytes) + (2 << 20))))

    cost = pl.CostEstimate(
        flops=2 * n * p_rows * l_in * l_out,
        transcendentals=0,
        bytes_accessed=(n * p_rows * l_in * itemsize
                        + q_bytes
                        + n * r_grid * p_rows * l_out * itemsize),
    )

    pooled = pl.pallas_call(
        functools.partial(_pool_kernel, inv_area=1.0 / float(stride * stride)),
        out_shape=jax.ShapeDtypeStruct((n, r_grid * p_rows, l_out), x.dtype),
        grid=grid,
        in_specs=[
            # x block index does not depend on e -> fetched once per image tile,
            # reused by the zero-channel steps.
            pl.BlockSpec((bn, p_rows, l_in), lambda i, e: (i, 0, 0)),
            # Constant selector block (fetched once; tiny, so default double
            # buffering costs nothing).
            pl.BlockSpec((l_in, l_out), lambda i, e: (0, 0)),
        ],
        out_specs=pl.BlockSpec((bn, p_rows, l_out), lambda i, e: (i, e, 0)),
        compiler_params=pltpu.CompilerParams(
            dimension_semantics=("parallel", "arbitrary"),
            vmem_limit_bytes=vmem_limit,
        ),
        cost_estimate=cost,
    )(x_rows, qg)

    # Free (contiguous) reshapes back to NCHW with channels ordered
    # [pooled C_in | zero channels], exactly like torch.cat([x] + [x*0]*...).
    out = pooled.reshape(n, r_grid, c_in, h_out // g, g, w_out)
    out = out.reshape(n, r_grid * c_in, h_out, w_out)

    if expand_ratio > r_grid:
        # Rare fallback (p_rows not 8-aligned): zero channels via a pad pass.
        out = jnp.pad(out, ((0, 0), (0, (expand_ratio - r_grid) * c_in), (0, 0), (0, 0)))
    return out


def _reference(x, n_out, stride):
    """Pure-JAX reference matching PyTorch semantics (for validation)."""
    n, c_in, h, w = x.shape
    h_out, w_out = h // stride, w // stride
    xr = x[:, :, : h_out * stride, : w_out * stride].reshape(
        n, c_in, h_out, stride, w_out, stride
    )
    pooled = xr.mean(axis=(3, 5))
    r = max(1, n_out // c_in)
    zeros = jnp.zeros((n, (r - 1) * c_in, h_out, w_out), x.dtype)
    return jnp.concatenate([pooled, zeros], axis=1)


if __name__ == "__main__":
    # DownsampleB(nIn=4, nOut=8, stride=2) on a (2, 4, 16, 16) input.
    n_in, n_out, stride = 4, 8, 2
    key = jax.random.PRNGKey(0)
    x = jax.random.normal(key, (2, n_in, 16, 16), dtype=jnp.float32)

    out = downsample_b(x, n_out, stride)
    out = jax.block_until_ready(out)

    ref = _reference(x, n_out, stride)
    assert out.shape == (2, n_out, 8, 8), out.shape
    assert jnp.allclose(out, ref, atol=1e-5, rtol=1e-5), "mismatch vs reference"

    print("KERNEL_OK")
</pallas_src>

<mosaic_0001>
module attributes {stable_mosaic.version = 11 : i64} {
  func.func @_pool_kernel(%arg0: i32, %arg1: i32, %arg2: memref<1x8x128xf32, #tpu.memory_space<vmem>>, %arg3: memref<128x32xf32, #tpu.memory_space<vmem>>, %arg4: memref<1x8x32xf32, #tpu.memory_space<vmem>>) attributes {dimension_semantics = [#tpu.dimension_semantics<parallel>, #tpu.dimension_semantics<arbitrary>], iteration_bounds = array<i64: 2, 2>, scalar_prefetch = 0 : i64, scratch_operands = 0 : i64, tpu.core_type = #tpu.core_type<tc>, window_params = [{transform_indices = @transform_0, window_bounds = array<i64: 1, 8, 128>}, {pipeline_mode = #tpu.pipeline_mode<synchronous>, transform_indices = @transform_1, window_bounds = array<i64: 128, 32>}, {transform_indices = @transform_2, window_bounds = array<i64: 1, 8, 32>}]} {
    %c0_i32 = arith.constant 0 : i32
    %0 = arith.cmpi eq, %arg1, %c0_i32 : i32
    %1 = arith.extui %0 : i1 to i32
    %c0_i32_0 = arith.constant 0 : i32
    %2 = arith.cmpi ne, %1, %c0_i32_0 : i32
    scf.if %2 {
      %c0 = arith.constant 0 : index
      %c0_3 = arith.constant 0 : index
      %c0_4 = arith.constant 0 : index
      %6 = vector.load %arg2[%c0, %c0_3, %c0_4] : memref<1x8x128xf32, #tpu.memory_space<vmem>>, vector<1x8x128xf32>
      %7 = vector.shape_cast %6 : vector<1x8x128xf32> to vector<8x128xf32>
      %c0_5 = arith.constant 0 : index
      %c0_6 = arith.constant 0 : index
      %8 = vector.load %arg3[%c0_5, %c0_6] : memref<128x32xf32, #tpu.memory_space<vmem>>, vector<128x32xf32>
      %cst = arith.constant dense<0.000000e+00> : vector<8x32xf32>
      %9 = tpu.matmul %7, %8, %cst {dimension_numbers = #tpu.dot_dimension_numbers<[1], [0], [0], [1], [0, 0, 1, 1], [], []>} : vector<8x128xf32>, vector<128x32xf32>, vector<8x32xf32> -> vector<8x32xf32>
      %cst_7 = arith.constant 2.500000e-01 : f32
      %10 = vector.broadcast %cst_7 : f32 to vector<8x32xf32>
      %11 = arith.mulf %9, %10 : vector<8x32xf32>
      %12 = vector.shape_cast %11 : vector<8x32xf32> to vector<1x8x32xf32>
      %c0_8 = arith.constant 0 : index
      %c0_9 = arith.constant 0 : index
      %c0_10 = arith.constant 0 : index
      %13 = vector.load %arg4[%c0_8, %c0_9, %c0_10] : memref<1x8x32xf32, #tpu.memory_space<vmem>>, vector<1x8x32xf32>
      tpu.vector_store %arg4[%c0_8, %c0_9, %c0_10], %12 {strides = array<i32>} : memref<1x8x32xf32, #tpu.memory_space<vmem>>, vector<1x8x32xf32>,
    } else {
    }
    %c0_i32_1 = arith.constant 0 : i32
    %3 = arith.cmpi sgt, %arg1, %c0_i32_1 : i32
    %4 = arith.extui %3 : i1 to i32
    %c0_i32_2 = arith.constant 0 : i32
    %5 = arith.cmpi ne, %4, %c0_i32_2 : i32
    scf.if %5 {
      %cst = arith.constant 0.000000e+00 : f32
      %6 = vector.broadcast %cst : f32 to vector<1x8x32xf32>
      %c0 = arith.constant 0 : index
      %c0_3 = arith.constant 0 : index
      %c0_4 = arith.constant 0 : index
      %7 = vector.load %arg4[%c0, %c0_3, %c0_4] : memref<1x8x32xf32, #tpu.memory_space<vmem>>, vector<1x8x32xf32>
      tpu.vector_store %arg4[%c0, %c0_3, %c0_4], %6 {strides = array<i32>} : memref<1x8x32xf32, #tpu.memory_space<vmem>>, vector<1x8x32xf32>,
    } else {
    }
    return
  }
  func.func @transform_0(%arg0: i32, %arg1: i32) -> (i32, i32, i32) {
    %c0_i32 = arith.constant 0 : i32
    %c0_i32_0 = arith.constant 0 : i32
    %c0_i32_1 = arith.constant 0 : i32
    return %arg0, %c0_i32, %c0_i32_0 : i32, i32, i32
  }
  func.func @transform_1(%arg0: i32, %arg1: i32) -> (i32, i32) {
    %c0_i32 = arith.constant 0 : i32
    %c0_i32_0 = arith.constant 0 : i32
    %c0_i32_1 = arith.constant 0 : i32
    return %c0_i32, %c0_i32_0 : i32, i32
  }
  func.func @transform_2(%arg0: i32, %arg1: i32) -> (i32, i32, i32) {
    %c0_i32 = arith.constant 0 : i32
    %c0_i32_0 = arith.constant 0 : i32
    return %arg0, %arg1, %c0_i32 : i32, i32, i32
  }
}

</mosaic_0001>

<bundles_post_ra>
// kernel: downsample_b.1
= control target key start
LH: loop header
LB: loop body
LE: loop exit
PB: predicated region body
PF: predicated region fallthrough
CT: control target
= control target key end

     0   :  { %s532_s9 = smov 0   ;;  %s534_s10 = smov 0   ;;  %s644_s0 = inlined_call_operand.vmem [shape: f32[2,8,128], index: 0, kind: input, shape index: {}]   ;;  %s645_s1 = inlined_call_operand.vmem [shape: f32[128,32], index: 1, kind: input, shape index: {}]   ;;  %s646_s2 = inlined_call_operand.vmem [shape: f32[2,16,32], index: 2, kind: output, shape index: {}]  }
   0x1   :  { %s536_s11 = smov 0   ;;  %s538_s12 = smov 0  }
   0x2   :  { %s540_s13 = smov 0  }
   0x3 LB: > { %s21_s14 = sadd.s32 1, %s503_s11  ;;  %s24_s15 = sadd.s32 1, %s507_s12  ;;  %s511_s13 = sphi %s540_s13, %s12_s13   ;;  %s507_s12 = sphi %s538_s12, %s650_s12   ;;  %s503_s11 = sphi %s536_s11, %s649_s11   ;;  %s499_s10 = sphi %s534_s10, %s648_s10   ;;  %s495_s9 = sphi %s532_s9, %s647_s9  }
   0x4   : > { %p22_p0 = scmp.ge.s32.totalorder %s21_s14, 2  ;;  %p345_p1 = scmp.ge.s32.totalorder %s511_s13, 1 }
   0x5   : > { %p125_p2 = scmp.lt.s32.totalorder %s511_s13, 5 }
   0x6   : > { %s652_s14 = smov (%p22_p0, %s21_s14), 0  ;;  %s654_s15 = smov (!%p22_p0, %s24_s15), %s507_s12 }
   0x7   : > { %p126_p3 = pnand %p345_p1, %p125_p2  ;;  %p26_p4 = scmp.ge.s32.totalorder %s654_s15, 2 }
   0x8   : > { %p149_p5 = scmp.lt.s32.totalorder (!%p126_p3), %s499_s10, 1  ;;  %p155_p6 = scmp.lt.s32.totalorder (!%p126_p3), %s495_s9, 1 }
   0x9   : > { %s656_s15 = smov (%p26_p4, %s654_s15), 0  ;;  %129 = sbr.rel (%p126_p3) target bundleno = 276 (0x114), region = 28 }
   0xa   : > { %p349_p7 = scmp.ne.s32.totalorder (!%p126_p3), %s495_s9, 0 }
  0x10   : > { %s658_s10 = smov (!%p149_p5, %s499_s10), 1  ;;  %164 = sbr.rel (%p349_p7) target bundleno = 267 (0x10b), region = 32 }
  0x11   : > { %s156_s16 = scalar_select %p155_p6, %s495_s9, 1 }
  0x12   : > { %s346_s17 = sshll.u32 %s658_s10, 3  ;;  %s347_s18 = sshll.u32 %s658_s10, 1  ;;  %v166_v0 = vld [vmem:[%s645_s1] sm:$0xff] (!%p349_p7)  ;;  %v167_v1 = vld [vmem:[%s645_s1 + $0x8] sm:$0xff] (!%p349_p7)  ;;  %v168_v2 = vld [vmem:[%s645_s1 + $0x10] sm:$0xff] (!%p349_p7)  ;;  %v513_v3 = vmov (!%p349_p7), 0.0|0.0  }
  0x13   : > { %s569_s21 = scalar_lea.vmem %s644_s0, %s346_s17  ;;  %s158_s22 = sadd.s32 %s347_s18, %s156_s16  ;;  %405 = vmatprep.subr.bf16.mxu0 (!%p349_p7), %v513_v3  ;;  %v406_v4 = vpack.c.bf16 (!%p349_p7), %v167_v1, %v166_v0  ;;  %v169_v5 = vld [vmem:[%s645_s1 + $0x18] sm:$0xff] (!%p349_p7)  ;;  %vm514_vm0 = vmmov (!%p349_p7), 0   ;;  %v515_v6 = vmov (!%p349_p7), 0.0   ;;  %v170_v8 = vld [vmem:[%s645_s1 + $0x20] sm:$0xff] (!%p349_p7)  ;;  %v171_v9 = vld [vmem:[%s645_s1 + $0x28] sm:$0xff] (!%p349_p7)  ;;  %vm253_vm1 = vcmask (!%p349_p7), 261120  }
  0x14   : > { %s348_s23 = sshll.u32 %s158_s22, 3  ;;  %402 = vmatprep.mubr.msk.f32.mxu0 (!%p349_p7), %vm514_vm0, %v515_v6  ;;  %v409_v7 = vpack.c.bf16 (!%p349_p7), %v169_v5, %v168_v2  ;;  %v412_v10 = vpack.c.bf16 (!%p349_p7), %v171_v9, %v170_v8  ;;  %v172_v11 = vld [vmem:[%s645_s1 + $0x30] sm:$0xff] (!%p349_p7)  ;;  %v173_v12 = vld [vmem:[%s645_s1 + $0x38] sm:$0xff] (!%p349_p7)  ;;  %v174_v14 = vld [vmem:[%s645_s1 + $0x40] sm:$0xff] (!%p349_p7) }
  0x15   : > { %s574_s26 = scalar_lea.vmem %s646_s2, %s348_s23  ;;  %407 = vmatpush3.bf16.msra.mxu0 (!%p349_p7), %v406_v4  ;;  %v415_v13 = vpack.c.bf16 (!%p349_p7), %v173_v12, %v172_v11  ;;  %v175_v15 = vld [vmem:[%s645_s1 + $0x48] sm:$0xff] (!%p349_p7)  ;;  %v176_v17 = vld [vmem:[%s645_s1 + $0x50] sm:$0xff] (!%p349_p7)  ;;  %v177_v18 = vld [vmem:[%s645_s1 + $0x58] sm:$0xff] (!%p349_p7) }
  0x16   : > { %408 = vmatprep.subr.bf16.mxu0 (!%p349_p7), %v513_v3  ;;  %v418_v16 = vpack.c.bf16 (!%p349_p7), %v175_v15, %v174_v14  ;;  %v421_v19 = vpack.c.bf16 (!%p349_p7), %v177_v18, %v176_v17  ;;  %v178_v20 = vld [vmem:[%s645_s1 + $0x60] sm:$0xff] (!%p349_p7)  ;;  %v179_v21 = vld [vmem:[%s645_s1 + $0x68] sm:$0xff] (!%p349_p7)  ;;  %v180_v23 = vld [vmem:[%s645_s1 + $0x70] sm:$0xff] (!%p349_p7) }
  0x17   : > { %v424_v22 = vpack.c.bf16 %v179_v21, %v178_v20  ;;  %v181_v24 = vld [vmem:[%s645_s1 + $0x78] sm:$0xff]  ;;  %v165_v26 = vld [vmem:[%s569_s21] sm:$0xff] }
  0x18   : > { %v427_v25 = vpack.c.bf16 %v181_v24, %v180_v23 }
  0x19   : > { %410 = vmatpush3.bf16.msra.mxu0 %v409_v7 }
  0x1a   : > { %411 = vmatprep.subr.bf16.mxu0 %v513_v3 }
  0x1d   : > { %413 = vmatpush3.bf16.msra.mxu0 %v412_v10 }
  0x1e   : > { %414 = vmatprep.subr.bf16.mxu0 %v513_v3 }
  0x21   : > { %416 = vmatpush3.bf16.msra.mxu0 %v415_v13 }
  0x22   : > { %417 = vmatprep.subr.bf16.mxu0 %v513_v3 }
  0x25   : > { %419 = vmatpush3.bf16.msra.mxu0 %v418_v16 }
  0x26   : > { %420 = vmatprep.subr.bf16.mxu0 %v513_v3 }
  0x29   : > { %422 = vmatpush3.bf16.msra.mxu0 %v421_v19 }
  0x2a   : > { %423 = vmatprep.subr.bf16.mxu0 %v513_v3 }
  0x2d   : > { %425 = vmatpush3.bf16.msra.mxu0 %v424_v22 }
  0x2e   : > { %426 = vmatprep.subr.bf16.mxu0 %v513_v3 }
  0x31   : > { %428 = vmatpush3.bf16.msra.mxu0 %v427_v25 }
  0x34   : > { %403 = vmatmul.mubr.f32.vlgmr.msra.gmra.mrb[0].mxu0 %v165_v26 }
 0x107   : > { %v248_v27 = vpop.f32.mrb[0].mxu0 }
 0x108   : > { %v252_v28 = vmul.f32 0.25, %v248_v27  ;;  %v404_v29 = vpop.f32.mrb[1].mxu0 }
 0x10a   : > { %254 = vst.msk [vmem:[%s574_s26] sm:$0xff] %vm253_vm1, %v252_v28 }
 0x10b PF: > { %p350_p8 = scmp.le.s32.totalorder %s495_s9, 0 }
 0x10c   : > { %vm259_vm2 = vcmask (!%p350_p8), 261120   ;;  %v516_v30 = vmov (!%p350_p8), 0.0  }
 0x10d   : > { %258 = sbr.rel (%p350_p8) target bundleno = 276 (0x114), region = 36  ;;  %260 = vst.msk [vmem:[%s574_s26] sm:$0xff] (!%p350_p8), %vm259_vm2, %v516_v30 }
 0x114 PF: > { %s12_s13 = sadd.s32 1, %s511_s13   ;;  %s647_s9 = smov %s503_s11 }
 0x115   : > { %p9_p9 = scmp.ge.s32.totalorder %s12_s13, 6   ;;  %s648_s10 = smov %s507_s12 }
 0x116   : > { %s649_s11 = smov %s652_s14  ;;  %s650_s12 = smov %s656_s15 }
 0x117   :  { %11 = sbr.rel (!%p9_p9) target bundleno = 3 (0x3), region = 66 }

</bundles_post_ra>
